<compile_context>
chip_gen: v6e
topology: v6e:2x2x1
jax: 0.10.0
libtpu: 0.0.40
codegen_flags: <defaults>
</compile_context>

<pallas_src>
import math

import jax
import jax.numpy as jnp
from jax.experimental import pallas as pl
from jax.experimental.pallas import tpu as pltpu


def _make_dice_partial_kernel(tile_m: int, valid_cols: int, need_mask: bool):
    """Kernel producing per-batch, per-class partial intersection/cardinality sums."""

    def kernel(logits_ref, targets_ref, inter_ref, card_ref):
        i = pl.program_id(1)  # voxel-tile index (reduction axis, "arbitrary")

        @pl.when(i == 0)
        def _():
            inter_ref[...] = jnp.zeros_like(inter_ref)
            card_ref[...] = jnp.zeros_like(card_ref)

        logits = logits_ref[0]                      # (C, TM) float32
        tgt = targets_ref[0].astype(jnp.int32)      # (1, TM) widened target ids

        # Numerically-stable softmax over the class (sublane) axis.
        m = jnp.max(logits, axis=0, keepdims=True)                      # XLU
        e = jnp.exp(logits - m)                                         # EUP
        inv = pl.reciprocal(jnp.sum(e, axis=0, keepdims=True))          # (1, TM)
        probs = e * inv                                                 # VALU

        # One-hot via class-index iota compare (no scatter needed).
        class_ids = jax.lax.broadcasted_iota(jnp.int32, logits.shape, 0)
        onehot = (class_ids == tgt).astype(jnp.float32)                 # (C, TM)

        if need_mask:
            # Padded lanes (beyond the real voxel count) must not contribute.
            col = i * tile_m + jax.lax.broadcasted_iota(
                jnp.int32, (1, logits.shape[1]), 1)
            valid = (col < valid_cols).astype(jnp.float32)              # (1, TM)
            probs = probs * valid
            onehot = onehot * valid

        inter_ref[0] += jnp.sum(probs * onehot, axis=1, keepdims=True)          # (C,1)
        card_ref[0] += (jnp.sum(probs, axis=1, keepdims=True)
                        + jnp.sum(onehot, axis=1, keepdims=True))                # (C,1)

    return kernel


def _choose_tile(dhw: int, num_classes: int, tgt_itemsize: int, tile_m: int) -> int:
    """Largest lane-tile that fits a ~20 MiB double-buffered input budget,
    preferring one that divides dhw exactly (avoids a wrapper-side pad copy)."""
    per_col = 2 * (4 * num_classes + tgt_itemsize)      # double-buffered bytes / column
    cap = max(128, (20 << 20) // per_col)
    cap = min(cap, max(tile_m, 128), dhw)
    if cap >= dhw:
        return dhw                                      # single full-width block (legal)
    t = (cap // 128) * 128
    probe = t
    for _ in range(4096):                               # cheap trace-time search
        if probe < 128:
            break
        if dhw % probe == 0:
            return probe
        probe -= 128
    return t  # no exact divisor found -> caller pads dhw up to a multiple of t


def dice_loss(logits, targets, smooth: float = 1.0, tile_m: int = 256 * 1024):
    """logits: (N, C, D, H, W) float; targets: (N, D, H, W) int. Returns scalar loss."""
    N, C = int(logits.shape[0]), int(logits.shape[1])
    DHW = int(math.prod(logits.shape[2:]))

    # Free, contiguous reshapes (no HBM transpose).
    logits_f = logits.astype(jnp.float32).reshape(N, C, DHW)
    if targets.dtype in (jnp.int8, jnp.uint8):
        tgt = targets.reshape(N, 1, DHW)                # stream small labels as-is
    else:
        tgt = targets.astype(jnp.int32).reshape(N, 1, DHW)
    t_itemsize = int(tgt.dtype.itemsize)

    tm = _choose_tile(DHW, C, t_itemsize, int(tile_m))
    m_padded = ((DHW + tm - 1) // tm) * tm
    need_mask = m_padded != DHW
    if need_mask:
        # Rare fallback for ragged voxel counts: minimal zero-pad, masked in-kernel.
        logits_f = jnp.pad(logits_f, ((0, 0), (0, 0), (0, m_padded - DHW)))
        tgt = jnp.pad(tgt, ((0, 0), (0, 0), (0, m_padded - DHW)))

    grid = (N, m_padded // tm)
    kernel = _make_dice_partial_kernel(tm, DHW, need_mask)

    vmem_in = 2 * (4 * C + t_itemsize) * tm             # double-buffered input bytes
    vmem_limit = int(min(48 << 20, max(16 << 20, 2 * vmem_in)))

    inter, card = pl.pallas_call(
        kernel,
        out_shape=(
            jax.ShapeDtypeStruct((N, C, 1), jnp.float32),
            jax.ShapeDtypeStruct((N, C, 1), jnp.float32),
        ),
        grid_spec=pltpu.PrefetchScalarGridSpec(
            num_scalar_prefetch=0,
            grid=grid,
            in_specs=[
                pl.BlockSpec((1, C, tm), lambda n, i: (n, 0, i)),
                pl.BlockSpec((1, 1, tm), lambda n, i: (n, 0, i)),
            ],
            out_specs=[
                pl.BlockSpec((1, C, 1), lambda n, i: (n, 0, 0)),
                pl.BlockSpec((1, C, 1), lambda n, i: (n, 0, 0)),
            ],
        ),
        compiler_params=pltpu.CompilerParams(
            dimension_semantics=("parallel", "arbitrary"),
            vmem_limit_bytes=vmem_limit,
        ),
    )(logits_f, tgt)

    # Tiny finalization in the wrapper (lets the batch axis shard across cores).
    inter_c = jnp.sum(inter[:, :, 0], axis=0)           # (C,)
    card_c = jnp.sum(card[:, :, 0], axis=0)             # (C,)
    dice = (2.0 * inter_c + smooth) / (card_c + smooth)
    return 1.0 - jnp.mean(dice)


def dice_loss_ref(logits, targets, smooth: float = 1.0):
    """Pure-JAX reference mirroring the PyTorch module."""
    num_classes = logits.shape[1]
    probs = jax.nn.softmax(logits, axis=1)
    onehot = jax.nn.one_hot(targets, num_classes, axis=1, dtype=probs.dtype)
    inter = jnp.sum(probs * onehot, axis=(0, 2, 3, 4))
    card = jnp.sum(probs + onehot, axis=(0, 2, 3, 4))
    dice = (2.0 * inter + smooth) / (card + smooth)
    return 1.0 - jnp.mean(dice)


if __name__ == "__main__":
    key = jax.random.PRNGKey(0)
    k1, k2, k3, k4 = jax.random.split(key, 4)

    # Case 1: typical small UNet-3D shape (voxel axis evenly divisible).
    N, C, D, H, W = 2, 4, 8, 16, 16
    logits = jax.random.normal(k1, (N, C, D, H, W), dtype=jnp.float32)
    targets = jax.random.randint(k2, (N, D, H, W), 0, C, dtype=jnp.int32)

    out1 = jax.block_until_ready(dice_loss(logits, targets, smooth=1.0))
    ref1 = jax.block_until_ready(dice_loss_ref(logits, targets, smooth=1.0))
    assert jnp.allclose(out1, ref1, atol=1e-5, rtol=1e-5), (out1, ref1)

    # Same inputs with uint8 labels (smaller HBM target stream).
    out1b = jax.block_until_ready(dice_loss(logits, targets.astype(jnp.uint8), smooth=1.0))
    assert jnp.allclose(out1b, ref1, atol=1e-5, rtol=1e-5), (out1b, ref1)

    # Small tile to exercise multi-step accumulation over the voxel axis.
    out1c = jax.block_until_ready(dice_loss(logits, targets, smooth=1.0, tile_m=512))
    assert jnp.allclose(out1c, ref1, atol=1e-5, rtol=1e-5), (out1c, ref1)

    # Case 2: ragged voxel count (5*7*9 = 315), odd class count -> pad + mask path.
    N2, C2, D2, H2, W2 = 3, 3, 5, 7, 9
    logits2 = jax.random.normal(k3, (N2, C2, D2, H2, W2), dtype=jnp.float32)
    targets2 = jax.random.randint(k4, (N2, D2, H2, W2), 0, C2, dtype=jnp.int32)
    out2 = jax.block_until_ready(dice_loss(logits2, targets2, smooth=1.0, tile_m=128))
    ref2 = jax.block_until_ready(dice_loss_ref(logits2, targets2, smooth=1.0))
    assert jnp.allclose(out2, ref2, atol=1e-5, rtol=1e-5), (out2, ref2)

    print("KERNEL_OK")
</pallas_src>

<mosaic_0001>
module attributes {stable_mosaic.version = 11 : i64} {
  func.func @kernel(%arg0: i32, %arg1: i32, %arg2: memref<1x4x2048xf32, #tpu.memory_space<vmem>>, %arg3: memref<1x1x2048xi32, #tpu.memory_space<vmem>>, %arg4: memref<1x4x1xf32, #tpu.memory_space<vmem>>, %arg5: memref<1x4x1xf32, #tpu.memory_space<vmem>>) attributes {dimension_semantics = [#tpu.dimension_semantics<parallel>, #tpu.dimension_semantics<arbitrary>], iteration_bounds = array<i64: 2, 1>, scalar_prefetch = 0 : i64, scratch_operands = 0 : i64, tpu.core_type = #tpu.core_type<tc>, window_params = [{transform_indices = @transform_0, window_bounds = array<i64: 1, 4, 2048>}, {transform_indices = @transform_1, window_bounds = array<i64: 1, 1, 2048>}, {transform_indices = @transform_2, window_bounds = array<i64: 1, 4, 1>}, {transform_indices = @transform_3, window_bounds = array<i64: 1, 4, 1>}]} {
    %c0_i32 = arith.constant 0 : i32
    %0 = arith.cmpi eq, %arg1, %c0_i32 : i32
    %1 = arith.extui %0 : i1 to i32
    %c0_i32_0 = arith.constant 0 : i32
    %2 = arith.cmpi ne, %1, %c0_i32_0 : i32
    scf.if %2 {
      %cst_22 = arith.constant 0.000000e+00 : f32
      %42 = vector.broadcast %cst_22 : f32 to vector<1x4x1xf32>
      %c0_23 = arith.constant 0 : index
      %c0_24 = arith.constant 0 : index
      %c0_25 = arith.constant 0 : index
      %43 = vector.load %arg4[%c0_23, %c0_24, %c0_25] : memref<1x4x1xf32, #tpu.memory_space<vmem>>, vector<1x4x1xf32>
      tpu.vector_store %arg4[%c0_23, %c0_24, %c0_25], %42 {strides = array<i32>} : memref<1x4x1xf32, #tpu.memory_space<vmem>>, vector<1x4x1xf32>,
      %cst_26 = arith.constant 0.000000e+00 : f32
      %44 = vector.broadcast %cst_26 : f32 to vector<1x4x1xf32>
      %c0_27 = arith.constant 0 : index
      %c0_28 = arith.constant 0 : index
      %c0_29 = arith.constant 0 : index
      %45 = vector.load %arg5[%c0_27, %c0_28, %c0_29] : memref<1x4x1xf32, #tpu.memory_space<vmem>>, vector<1x4x1xf32>
      tpu.vector_store %arg5[%c0_27, %c0_28, %c0_29], %44 {strides = array<i32>} : memref<1x4x1xf32, #tpu.memory_space<vmem>>, vector<1x4x1xf32>,
    } else {
    }
    %c0 = arith.constant 0 : index
    %c0_1 = arith.constant 0 : index
    %c0_2 = arith.constant 0 : index
    %3 = vector.load %arg2[%c0, %c0_1, %c0_2] : memref<1x4x2048xf32, #tpu.memory_space<vmem>>, vector<1x4x2048xf32>
    %4 = vector.shape_cast %3 : vector<1x4x2048xf32> to vector<4x2048xf32>
    %c0_3 = arith.constant 0 : index
    %c0_4 = arith.constant 0 : index
    %c0_5 = arith.constant 0 : index
    %5 = vector.load %arg3[%c0_3, %c0_4, %c0_5] : memref<1x1x2048xi32, #tpu.memory_space<vmem>>, vector<1x1x2048xi32>
    %6 = vector.shape_cast %5 : vector<1x1x2048xi32> to vector<1x2048xi32>
    %cst = arith.constant dense<0xFF800000> : vector<2048xf32>
    %7 = vector.multi_reduction <maximumf>, %4, %cst [0] : vector<4x2048xf32> to vector<2048xf32>
    %8 = vector.shape_cast %7 : vector<2048xf32> to vector<1x2048xf32>
    %9 = vector.broadcast %8 : vector<1x2048xf32> to vector<4x2048xf32>
    %10 = arith.subf %4, %9 : vector<4x2048xf32>
    %11 = math.exp %10 : vector<4x2048xf32>
    %cst_6 = arith.constant dense<0.000000e+00> : vector<2048xf32>
    %12 = vector.multi_reduction <add>, %11, %cst_6 [0] : vector<4x2048xf32> to vector<2048xf32>
    %13 = vector.shape_cast %12 : vector<2048xf32> to vector<1x2048xf32>
    %14 = tpu.reciprocal %13 : vector<1x2048xf32> -> vector<1x2048xf32>
    %15 = vector.broadcast %14 : vector<1x2048xf32> to vector<4x2048xf32>
    %16 = arith.mulf %11, %15 : vector<4x2048xf32>
    %17 = tpu.iota {dimensions = array<i32: 0>} : vector<4x2048xi32>
    %18 = vector.broadcast %6 : vector<1x2048xi32> to vector<4x2048xi32>
    %19 = arith.cmpi eq, %17, %18 : vector<4x2048xi32>
    %20 = arith.extui %19 : vector<4x2048xi1> to vector<4x2048xi32>
    %21 = arith.sitofp %20 : vector<4x2048xi32> to vector<4x2048xf32>
    %c0_7 = arith.constant 0 : index
    %c0_8 = arith.constant 0 : index
    %c0_9 = arith.constant 0 : index
    %22 = vector.load %arg4[%c0_7, %c0_8, %c0_9] : memref<1x4x1xf32, #tpu.memory_space<vmem>>, vector<1x4x1xf32>
    %23 = vector.shape_cast %22 : vector<1x4x1xf32> to vector<4x1xf32>
    %24 = arith.mulf %16, %21 : vector<4x2048xf32>
    %cst_10 = arith.constant dense<0.000000e+00> : vector<4xf32>
    %25 = vector.multi_reduction <add>, %24, %cst_10 [1] : vector<4x2048xf32> to vector<4xf32>
    %26 = vector.shape_cast %25 : vector<4xf32> to vector<4x1xf32>
    %27 = arith.addf %23, %26 : vector<4x1xf32>
    %c0_11 = arith.constant 0 : index
    %c0_12 = arith.constant 0 : index
    %c0_13 = arith.constant 0 : index
    %28 = vector.load %arg4[%c0_11, %c0_12, %c0_13] : memref<1x4x1xf32, #tpu.memory_space<vmem>>, vector<1x4x1xf32>
    %29 = vector.shape_cast %28 : vector<1x4x1xf32> to vector<4x1xf32>
    %30 = vector.shape_cast %27 : vector<4x1xf32> to vector<1x4x1xf32>
    tpu.vector_store %arg4[%c0_11, %c0_12, %c0_13], %30 {strides = array<i32>} : memref<1x4x1xf32, #tpu.memory_space<vmem>>, vector<1x4x1xf32>,
    %c0_14 = arith.constant 0 : index
    %c0_15 = arith.constant 0 : index
    %c0_16 = arith.constant 0 : index
    %31 = vector.load %arg5[%c0_14, %c0_15, %c0_16] : memref<1x4x1xf32, #tpu.memory_space<vmem>>, vector<1x4x1xf32>
    %32 = vector.shape_cast %31 : vector<1x4x1xf32> to vector<4x1xf32>
    %cst_17 = arith.constant dense<0.000000e+00> : vector<4xf32>
    %33 = vector.multi_reduction <add>, %16, %cst_17 [1] : vector<4x2048xf32> to vector<4xf32>
    %34 = vector.shape_cast %33 : vector<4xf32> to vector<4x1xf32>
    %cst_18 = arith.constant dense<0.000000e+00> : vector<4xf32>
    %35 = vector.multi_reduction <add>, %21, %cst_18 [1] : vector<4x2048xf32> to vector<4xf32>
    %36 = vector.shape_cast %35 : vector<4xf32> to vector<4x1xf32>
    %37 = arith.addf %34, %36 : vector<4x1xf32>
    %38 = arith.addf %32, %37 : vector<4x1xf32>
    %c0_19 = arith.constant 0 : index
    %c0_20 = arith.constant 0 : index
    %c0_21 = arith.constant 0 : index
    %39 = vector.load %arg5[%c0_19, %c0_20, %c0_21] : memref<1x4x1xf32, #tpu.memory_space<vmem>>, vector<1x4x1xf32>
    %40 = vector.shape_cast %39 : vector<1x4x1xf32> to vector<4x1xf32>
    %41 = vector.shape_cast %38 : vector<4x1xf32> to vector<1x4x1xf32>
    tpu.vector_store %arg5[%c0_19, %c0_20, %c0_21], %41 {strides = array<i32>} : memref<1x4x1xf32, #tpu.memory_space<vmem>>, vector<1x4x1xf32>,
    return
  }
  func.func @transform_0(%arg0: i32, %arg1: i32) -> (i32, i32, i32) {
    %c0_i32 = arith.constant 0 : i32
    %c0_i32_0 = arith.constant 0 : i32
    return %arg0, %c0_i32, %arg1 : i32, i32, i32
  }
  func.func @transform_1(%arg0: i32, %arg1: i32) -> (i32, i32, i32) {
    %c0_i32 = arith.constant 0 : i32
    %c0_i32_0 = arith.constant 0 : i32
    return %arg0, %c0_i32, %arg1 : i32, i32, i32
  }
  func.func @transform_2(%arg0: i32, %arg1: i32) -> (i32, i32, i32) {
    %c0_i32 = arith.constant 0 : i32
    %c0_i32_0 = arith.constant 0 : i32
    %c0_i32_1 = arith.constant 0 : i32
    return %arg0, %c0_i32, %c0_i32_0 : i32, i32, i32
  }
  func.func @transform_3(%arg0: i32, %arg1: i32) -> (i32, i32, i32) {
    %c0_i32 = arith.constant 0 : i32
    %c0_i32_0 = arith.constant 0 : i32
    %c0_i32_1 = arith.constant 0 : i32
    return %arg0, %c0_i32, %c0_i32_0 : i32, i32, i32
  }
}

</mosaic_0001>

<bundles_post_ra>
// kernel: tpu_custom_call.1
= control target key start
LH: loop header
LB: loop body
LE: loop exit
PB: predicated region body
PF: predicated region fallthrough
CT: control target
= control target key end

     0   :  { %9 = vsyncpa [#allocation3], 0  ;;  %s1924_s0 = inlined_call_operand.hbm [shape: f32[2,4,2048], index: 0, kind: input, shape index: {}]   ;;  %s1925_s1 = inlined_call_operand.hbm [shape: s32[2,1,2048], index: 1, kind: input, shape index: {}]   ;;  %s1926_s2 = inlined_call_operand.vmem [shape: f32[2,4,1], index: 2, kind: output, shape index: {0}]   ;;  %s1927_s3 = inlined_call_operand.vmem [shape: f32[2,4,1], index: 3, kind: output, shape index: {1}]  }
   0x1   :  { %11 = vsyncpa [#allocation3 + $0x1], 0 }
   0x2   :  { %12 = vsyncpa [#allocation5], 0 }
   0x3   :  { %14 = vsyncpa [#allocation5 + $0x1], 0  ;;  %s1389_s12 = smov 0   ;;  %s1391_s13 = smov 0  }
   0x4   :  { %s1393_s14 = smov 0   ;;  %s1395_s15 = smov 0  }
   0x5   :  { %s1397_s16 = smov 0   ;;  %s1399_s17 = smov 0  }
   0x6 LB: > { %s1102_s18 = sadd.s32 4294967295, %s1364_s17   ;;  %s32_s19 = sadd.s32 1, %s1360_s16  ;;  %s1364_s17 = sphi %s1399_s17, %s20_s17   ;;  %s1360_s16 = sphi %s1397_s16, %s1942_s16   ;;  %s1356_s15 = sphi %s1395_s15, %s1941_s15   ;;  %s1352_s14 = sphi %s1393_s14, %s1940_s14   ;;  %s1348_s13 = sphi %s1391_s13, %s1939_s13   ;;  %s1344_s12 = sphi %s1389_s12, %s1938_s12  }
   0x7   : > { %p34_p0 = scmp.ge.s32.totalorder %s32_s19, 2  ;;  %s41_s20 = sadd.s32 1, %s1352_s14 }
   0x8   : > { %p48_p1 = scmp.ne.s32.totalorder %s1352_s14, %s1348_s13  ;;  %p49_p2 = scmp.eq.s32.totalorder %s1364_s17, 0 }
   0x9   : > { %s1944_s19 = smov (%p34_p0, %s32_s19), 0  ;;  %p54_p4 = scmp.ne.s32.totalorder %s1348_s13, %s1344_s12 }
   0xa   : > { %p1425_p3 = por %p49_p2, %p48_p1  ;;  %s36_s22 = ssub.s32 %s1360_s16, %s1944_s19 }
   0xb   : > { %p55_p5 = scmp.eq.s32.totalorder %s1102_s18, 0  ;;  %p39_p6 = scmp.eq.s32.totalorder %s36_s22, 0 }
   0xc   : > { %p1148_p8 = scmp.lt.s32.totalorder %s1364_s17, 2  ;;  %s1441_s25 = sand.u32 1, %s1352_s14  }
   0xd   : > { %p1432_p7 = por %p55_p5, %p54_p4  ;;  %s1135_s26 = sshll.u32 %s1360_s16, 10 }
   0xe   : > { %s1438_s24 = scalar_select %p39_p6, %s1352_s14, %s41_s20  }
   0xf   : > { %s1106_s27 = sshll.u32 %s1441_s25, 6  ;;  %s170_s30 = scalar_lea.hbm %s1924_s0, %s1135_s26 }
  0x10   : > { %s162_s4 = scalar_lea.vmem [#allocation2], %s1106_s27  ;;  %p1450_p9 = pnand %p1148_p8, %p1425_p3 }
  0x11   : > { %s172_s5 = sshll.u32 %s162_s4, 4  ;;  %p1112_p10 = scmp.ge.s32.totalorder %s1364_s17, 1  ;;  %s173_s5 = int_to_ptr.vmem [resolvable:$true] %s172_s5 }
  0x12   : > { %p198_p11 = scmp.lt.s32.totalorder %s1364_s17, 3  ;;  %s159_s7 = scalar_lea.sflag [#allocation3], %s1441_s25 }
  0x13   : > { %p1256_p12 = pneg %p1450_p9  ;;  %s1267_s8 = scalar_lea.vmem %s173_s5, 1024 }
  0x14   : > { %p1268_p13 = scmp.ne.s32.totalorder %s173_s5, %s1267_s8  ;;  %s1366_s9 = smov [#allocation2]  }
  0x15   : > { %s1272_s10 = sshll.u32 %s1366_s9, 4  ;;  %s1273_s10 = int_to_ptr.vmem [resolvable:$false] %s1272_s10 }
  0x16   : > { %p1270_p0 = pnand %p1268_p13, %p1256_p12  ;;  %s1274_s11 = scalar_lea.vmem %s1273_s10, 2048 }
  0x17   : > { %p1275_p2 = scmp.lt.s32.totalorder %s173_s5, %s1273_s10  ;;  %p1276_p3 = scmp.lt.s32.totalorder %s1274_s11, %s1267_s8 }
  0x18   : > { %p1271_p1 = pneg %p1270_p0 }
  0x19   : > { %p1277_p4 = por %p1276_p3, %p1275_p2 }
  0x1b   : > { %p1278_p5 = pnand %p1277_p4, %p1271_p1 }
  0x1d   : > { %1281 = shalt.err (!%p1278_p5)
}
  0x1e   : > { %1144 = dma.hbm_to_vmem [thread:$0]  (!%p1450_p9), %s170_s30, 1024, %s173_s5, %s159_s7  }
  0x1f   : > { %p1468_p6 = pnand %p1112_p10, %p198_p11  ;;  %s1109_s18 = sshll.u32 %s1441_s25, 4 }
  0x20   : > { %s1136_s20 = sshll.u32 %s1360_s16, 8  ;;  %s183_s27 = scalar_lea.vmem [#allocation4], %s1109_s18 }
  0x21   : > { %s191_s26 = scalar_lea.hbm %s1925_s1, %s1136_s20  ;;  %s193_s28 = sshll.u32 %s183_s27, 4  ;;  %s194_s28 = int_to_ptr.vmem [resolvable:$true] %s193_s28 }
  0x22   : > { %s180_s29 = scalar_lea.sflag [#allocation5], %s1441_s25  ;;  %s1295_s4 = scalar_lea.vmem %s194_s28, 256 }
  0x23   : > { %p1296_p8 = scmp.ne.s32.totalorder %s194_s28, %s1295_s4  ;;  %s1367_s30 = smov [#allocation4]  }
  0x24   : > { %s1300_s5 = sshll.u32 %s1367_s30, 4  ;;  %s1301_s5 = int_to_ptr.vmem [resolvable:$false] %s1300_s5 }
  0x25   : > { %p1298_p13 = pnand %p1296_p8, %p1256_p12  ;;  %s1302_s7 = scalar_lea.vmem %s1301_s5, 512 }
  0x26   : > { %p1303_p10 = scmp.lt.s32.totalorder %s194_s28, %s1301_s5  ;;  %p1304_p11 = scmp.lt.s32.totalorder %s1302_s7, %s1295_s4 }
  0x27   : > { %p1299_p0 = pneg %p1298_p13 }
  0x28   : > { %p1305_p1 = por %p1304_p11, %p1303_p10 }
  0x2a   : > { %p1306_p2 = pnand %p1305_p1, %p1299_p0 }
  0x2c   : > { %1309 = shalt.err (!%p1306_p2)
}
  0x2d   : > { %1147 = dma.hbm_to_vmem [thread:$0]  (!%p1450_p9), %s191_s26, 256, %s194_s28, %s180_s29  }
  0x2e   : > { %202 = sbr.rel (%p1468_p6) target bundleno = 335 (0x14f), region = 28  ;;  %s204_s25 = sand.u32 (!%p1468_p6), 1, %s1348_s13  }
  0x2f   : > { %s1113_s8 = sshll.u32 (!%p1468_p6), %s204_s25, 6  ;;  %s205_s9 = scalar_lea.sflag (!%p1468_p6), [#allocation3], %s204_s25 }
  0x30   : > { %s208_s10 = scalar_lea.vmem (!%p1468_p6), [#allocation2], %s1113_s8 }
  0x33   : > { %1335 = dma.done.wait (%p1432_p7), %s205_s9, 1024  }
  0x34   : > { %1337 = vsyncadd (%p1432_p7), %s205_s9, 4294966272  ;;  %s1114_s11 = sshll.u32 %s204_s25, 4  ;;  %s214_s18 = scalar_lea.sflag [#allocation5], %s204_s25 }
  0x35   : > { %s1490_s20 = scalar_lea.vmem [#allocation4], %s1114_s11 }
  0x36   : > { %1339 = dma.done.wait (%p1432_p7), %s214_s18, 256  }
  0x37   : > { %1341 = vsyncadd (%p1432_p7), %s214_s18, 4294967040  ;;  %vm299_vm0 = vcmask 1043456   ;;  %v1496_v0 = vld [vmem:[%s208_s10] sm:$0xff]  ;;  %v1498_v1 = vld [vmem:[%s208_s10 + $0x8] sm:$0xff]  ;;  %p250_p7 = scmp.lt.s32.totalorder %s1356_s15, 1 }
  0x38   : > { %v1500_v2 = vld [vmem:[%s208_s10 + $0x10] sm:$0xff]  ;;  %v1502_v3 = vld [vmem:[%s208_s10 + $0x18] sm:$0xff]  ;;  %v1504_v4 = vld [vmem:[%s208_s10 + $0x20] sm:$0xff]  ;;  %v283_v6 = vcombine.high %v1496_v0, %v1496_v0  ;;  %v284_v7 = vcombine.high %v1498_v1, %v1498_v1  ;;  %v300_v9 = vsel %vm299_vm0, %v1496_v0, -inf  ;;  %v314_v19 = vsel %vm299_vm0, %v1498_v1, -inf }
  0x39   : > { %v1506_v5 = vld [vmem:[%s208_s10 + $0x28] sm:$0xff]  ;;  %v285_v8 = vcombine.high %v1500_v2, %v1500_v2  ;;  %v1516_v10 = vld [vmem:[%s208_s10 + $0x30] sm:$0xff]  ;;  %v1518_v11 = vld [vmem:[%s208_s10 + $0x38] sm:$0xff]  ;;  %v286_v12 = vcombine.high %v1502_v3, %v1502_v3  ;;  %v287_v13 = vcombine.high %v1504_v4, %v1504_v4  ;;  %v301_v15 = vrot.slane %v300_v9, 4  ;;  %s1946_s15 = smov (!%p250_p7, %s1356_s15), 1 }
  0x3a   : > { %v288_v14 = vcombine.high %v1506_v5, %v1506_v5  ;;  %v289_v16 = vcombine.high %v1516_v10, %v1516_v10  ;;  %v290_v17 = vcombine.high %v1518_v11, %v1518_v11  ;;  %v307_v18 = vsel %vm299_vm0, %v283_v6, -inf  ;;  %s1115_s23 = sshll.u32 %s1946_s15, 2 }
  0x3b   : > { %v302_v20 = vmax.f32 %v300_v9, %v301_v15  ;;  %v308_v21 = vrot.slane %v307_v18, 4  ;;  %v315_v22 = vrot.slane %v314_v19, 4  ;;  %v321_v23 = vsel %vm299_vm0, %v284_v7, -inf  ;;  %s253_s21 = scalar_lea.vmem %s1926_s2, %s1115_s23  ;;  %s257_s27 = scalar_lea.vmem %s1927_s3, %s1115_s23 }
  0x3c   : > { %v322_v24 = vrot.slane %v321_v23, 4  ;;  %v328_v25 = vsel %vm299_vm0, %v1500_v2, -inf  ;;  %v335_v26 = vsel %vm299_vm0, %v285_v8, -inf  ;;  %v342_v27 = vsel %vm299_vm0, %v1502_v3, -inf }
  0x3d   : > { %v303_v28 = vrot.slane %v302_v20, 2  ;;  %v309_v29 = vmax.f32 %v307_v18, %v308_v21  ;;  %v316_v30 = vmax.f32 %v314_v19, %v315_v22  ;;  %v329_v31 = vrot.slane %v328_v25, 4 }
  0x3e   : > { %v323_v32 = vmax.f32 %v321_v23, %v322_v24  ;;  %v336_v33 = vrot.slane %v335_v26, 4  ;;  %v343_v34 = vrot.slane %v342_v27, 4  ;;  %v349_v35 = vsel %vm299_vm0, %v286_v12, -inf }
  0x3f   : > { %v304_v36 = vmax.f32 %v302_v20, %v303_v28  ;;  %v310_v37 = vrot.slane %v309_v29, 2  ;;  %v317_v38 = vrot.slane %v316_v30, 2  ;;  %v330_v39 = vmax.f32 %v328_v25, %v329_v31 }
  0x40   : > { %v324_v40 = vrot.slane %v323_v32, 2  ;;  %v337_v41 = vmax.f32 %v335_v26, %v336_v33  ;;  %v344_v42 = vmax.f32 %v342_v27, %v343_v34  ;;  %v350_v43 = vrot.slane %v349_v35, 4 }
  0x41   : > { %v305_v44 = vrot.slane %v304_v36, 1  ;;  %v311_v45 = vmax.f32 %v309_v29, %v310_v37  ;;  %v318_v46 = vmax.f32 %v316_v30, %v317_v38  ;;  %v331_v47 = vrot.slane %v330_v39, 2 }
  0x42   : > { %v325_v48 = vmax.f32 %v323_v32, %v324_v40  ;;  %v338_v49 = vrot.slane %v337_v41, 2  ;;  %v345_v50 = vrot.slane %v344_v42, 2  ;;  %v351_v51 = vmax.f32 %v349_v35, %v350_v43 }
  0x43   : > { %v1540_v52 = vmax.f32 %v304_v36, %v305_v44  ;;  %v312_v53 = vrot.slane %v311_v45, 1  ;;  %v319_v54 = vrot.slane %v318_v46, 1  ;;  %v332_v55 = vmax.f32 %v330_v39, %v331_v47 }
  0x44   : > { %v326_v56 = vrot.slane %v325_v48, 1  ;;  %v339_v57 = vmax.f32 %v337_v41, %v338_v49  ;;  %v346_v58 = vmax.f32 %v344_v42, %v345_v50  ;;  %v352_v59 = vrot.slane %v351_v51, 2 }
  0x45   : > { %v1542_v60 = vmax.f32 %v311_v45, %v312_v53  ;;  %v1544_v61 = vmax.f32 %v318_v46, %v319_v54  ;;  %v333_v62 = vrot.slane %v332_v55, 1  ;;  %v356_v63 = vsel %vm299_vm0, %v1504_v4, -inf }
  0x46   : > { %v1548_v6 = vmax.f32 %v325_v48, %v326_v56  ;;  %v340_v7 = vrot.slane %v339_v57, 1  ;;  %v347_v8 = vrot.slane %v346_v58, 1  ;;  %v353_v9 = vmax.f32 %v351_v51, %v352_v59 }
  0x47   : > { %v1550_v12 = vmax.f32 %v332_v55, %v333_v62  ;;  %v357_v15 = vrot.slane %v356_v63, 4  ;;  %v363_v18 = vsel %vm299_vm0, %v287_v13, -inf  ;;  %v370_v19 = vsel %vm299_vm0, %v1506_v5, -inf }
  0x48   : > { %v1555_v20 = vmax.f32 %v339_v57, %v340_v7  ;;  %v1557_v21 = vmax.f32 %v346_v58, %v347_v8  ;;  %v354_v22 = vrot.slane %v353_v9, 1  ;;  %v364_v23 = vrot.slane %v363_v18, 4 }
  0x49   : > { %v358_v24 = vmax.f32 %v356_v63, %v357_v15  ;;  %v371_v25 = vrot.slane %v370_v19, 4  ;;  %v377_v26 = vsel %vm299_vm0, %v288_v14, -inf  ;;  %v384_v27 = vsel %vm299_vm0, %v1516_v10, -inf }
  0x4a   : > { %v355_v13 = vmax.f32 %v353_v9, %v354_v22  ;;  %v365_v28 = vmax.f32 %v363_v18, %v364_v23  ;;  %v378_v29 = vrot.slane %v377_v26, 4  ;;  %v385_v30 = vrot.slane %v384_v27, 4 }
  0x4b   : > { %v359_v31 = vrot.slane %v358_v24, 2  ;;  %v372_v32 = vmax.f32 %v370_v19, %v371_v25  ;;  %v391_v33 = vsel %vm299_vm0, %v289_v16, -inf  ;;  %v398_v34 = vsel %vm299_vm0, %v1518_v11, -inf }
  0x4c   : > { %v366_v35 = vrot.slane %v365_v28, 2  ;;  %v379_v36 = vmax.f32 %v377_v26, %v378_v29  ;;  %v386_v14 = vmax.f32 %v384_v27, %v385_v30  ;;  %v392_v37 = vrot.slane %v391_v33, 4 }
  0x4d   : > { %v360_v38 = vmax.f32 %v358_v24, %v359_v31  ;;  %v373_v39 = vrot.slane %v372_v32, 2  ;;  %v399_v40 = vrot.slane %v398_v34, 4  ;;  %v405_v41 = vsel %vm299_vm0, %v290_v17, -inf }
  0x4e   : > { %v367_v42 = vmax.f32 %v365_v28, %v366_v35  ;;  %v380_v43 = vrot.slane %v379_v36, 2  ;;  %v387_v44 = vrot.slane %v386_v14, 2  ;;  %v393_v45 = vmax.f32 %v391_v33, %v392_v37 }
  0x4f   : > { %v361_v16 = vrot.slane %v360_v38, 1  ;;  %v374_v46 = vmax.f32 %v372_v32, %v373_v39  ;;  %v400_v47 = vmax.f32 %v398_v34, %v399_v40  ;;  %v406_v48 = vrot.slane %v405_v41, 4  ;;  %v273_v40 = vld [vmem:[%s1490_s20] sm:$0xff] }
  0x50   : > { %v368_v49 = vrot.slane %v367_v42, 1  ;;  %v381_v50 = vmax.f32 %v379_v36, %v380_v43  ;;  %v388_v51 = vmax.f32 %v386_v14, %v387_v44  ;;  %v394_v53 = vrot.slane %v393_v45, 2 }
  0x51   : > { %v362_v54 = vmax.f32 %v360_v38, %v361_v16  ;;  %v375_v55 = vrot.slane %v374_v46, 1  ;;  %v401_v56 = vrot.slane %v400_v47, 2  ;;  %v407_v57 = vmax.f32 %v405_v41, %v406_v48 }
  0x52   : > { %v369_v58 = vmax.f32 %v367_v42, %v368_v49  ;;  %v382_v59 = vrot.slane %v381_v50, 1  ;;  %v389_v62 = vrot.slane %v388_v51, 1  ;;  %v395_v17 = vmax.f32 %v393_v45, %v394_v53 }
  0x53   : > { %v376_v63 = vmax.f32 %v374_v46, %v375_v55  ;;  %v402_v7 = vmax.f32 %v400_v47, %v401_v56  ;;  %v408_v8 = vrot.slane %v407_v57, 2  ;;  %v428_v9 = vcombine.low %v1540_v52, %v1542_v60 }
  0x54   : > { %v383_v15 = vmax.f32 %v381_v50, %v382_v59  ;;  %v390_v18 = vmax.f32 %v388_v51, %v389_v62  ;;  %v396_v19 = vrot.slane %v395_v17, 1  ;;  %v429_v22 = vcombine.low %v1544_v61, %v1548_v6 }
  0x55   : > { %v403_v23 = vrot.slane %v402_v7, 1  ;;  %v409_v24 = vmax.f32 %v407_v57, %v408_v8  ;;  %v430_v25 = vcombine.low %v1550_v12, %v1555_v20  ;;  %v431_v26 = vcombine.low %v1557_v21, %v355_v13 }
  0x56   : > { %v397_v27 = vmax.f32 %v395_v17, %v396_v19  ;;  %v432_v28 = vcombine.low %v362_v54, %v369_v58  ;;  %v433_v29 = vcombine.low %v376_v63, %v383_v15  ;;  %v444_v30 = vsub.f32 %v1496_v0, %v428_v9 }
  0x57   : > { %v404_v31 = vmax.f32 %v402_v7, %v403_v23  ;;  %v410_v52 = vrot.slane %v409_v24, 1  ;;  %v445_v60 = vsub.f32 %v1498_v1, %v429_v22  ;;  %v446_v32 = vsub.f32 %v1500_v2, %v430_v25 }
  0x58   : > { %v434_v33 = vcombine.low %v390_v18, %v397_v27  ;;  %v447_v61 = vsub.f32 %v1502_v3, %v431_v26  ;;  %v452_v34 = vmul.f32 1.442695, %v444_v30  ;;  %v448_v20 = vsub.f32 %v1504_v4, %v432_v28 }
  0x59   : > { %v411_v6 = vmax.f32 %v409_v24, %v410_v52  ;;  %v454_v35 = vmul.f32 1.442695, %v445_v60  ;;  %v456_v12 = vmul.f32 1.442695, %v446_v32  ;;  %v660_v21 = vlaneseq }
  0x5a   : > { %v449_v36 = vsub.f32 %v1506_v5, %v433_v29  ;;  %1206 = vpow2.f32 %v452_v34  ;;  %v458_v0 = vmul.f32 1.442695, %v447_v61  ;;  %v450_v1 = vsub.f32 %v1516_v10, %v434_v33 }
  0x5b   : > { %v435_v13 = vcombine.low %v404_v31, %v411_v6  ;;  %1208 = vpow2.f32 %v454_v35  ;;  %v460_v3 = vmul.f32 1.442695, %v448_v20  ;;  %v1590_v37 = vshrl.u32 %v660_v21, 7 }
  0x5c   : > { %1210 = vpow2.f32 %v456_v12  ;;  %v462_v14 = vmul.f32 1.442695, %v449_v36  ;;  %v464_v38 = vmul.f32 1.442695, %v450_v1  ;;  %v1368_v34 = vmov 0.0  }
  0x5d   : > { %v451_v2 = vsub.f32 %v1518_v11, %v435_v13  ;;  %1212 = vpow2.f32 %v458_v0  ;;  %v664_v5 = vsub.s32 0, %v1590_v37  ;;  %v668_v39 = vsub.s32 1, %v1590_v37 }
  0x5e   : > { %1214 = vpow2.f32 %v460_v3  ;;  %v672_v10 = vsub.s32 2, %v1590_v37  ;;  %v676_v11 = vsub.s32 3, %v1590_v37  ;;  %v680_v41 = vsub.s32 4, %v1590_v37 }
  0x5f   : > { %v466_v4 = vmul.f32 1.442695, %v451_v2  ;;  %1216 = vpow2.f32 %v462_v14  ;;  %v1930_v42 = vsub.s32 5, %v1590_v37  ;;  %v1929_v43 = vsub.s32 6, %v1590_v37 }
  0x60   : > { %1218 = vpow2.f32 %v464_v38  ;;  %v1928_v44 = vsub.s32 7, %v1590_v37  ;;  %v665_v45 = vrot.slane %v273_v40, %v664_v5  ;;  %v669_v46 = vrot.slane %v273_v40, %v668_v39 }
  0x61   : > { %1220 = vpow2.f32 %v466_v4  ;;  %v673_v47 = vrot.slane %v273_v40, %v672_v10  ;;  %v677_v48 = vrot.slane %v273_v40, %v676_v11  ;;  %v681_v49 = vrot.slane %v273_v40, %v680_v41 }
  0x62   : > { %v1621_v54 = vrot.slane %v273_v40, %v1930_v42  ;;  %v1625_v55 = vrot.slane %v273_v40, %v1929_v43  ;;  %v1635_v62 = vrot.slane %v273_v40, %v1928_v44  ;;  %vm726_vm1 = vcmp.eq.s32.totalorder %v1590_v37, %v665_v45 }
  0x63   : > { %vm727_vm2 = vcmp.eq.s32.totalorder %v1590_v37, %v669_v46  ;;  %vm728_vm3 = vcmp.eq.s32.totalorder %v1590_v37, %v673_v47  ;;  %vm729_vm4 = vcmp.eq.s32.totalorder %v1590_v37, %v677_v48  ;;  %vm730_vm5 = vcmp.eq.s32.totalorder %v1590_v37, %v681_v49 }
  0x64   : > { %v1664_v35 = vsel %vm726_vm1, 1.0, %v1368_v34  ;;  %v1669_v12 = vsel %vm727_vm2, 1.0, %v1368_v34  ;;  %v1674_v20 = vsel %vm728_vm3, 1.0, %v1368_v34  ;;  %v1682_v14 = vsel %vm729_vm4, 1.0, %v1368_v34 }
  0x65   : > { %v1685_v38 = vsel %vm730_vm5, 1.0, %v1368_v34  ;;  %vm731_vm6 = vcmp.eq.s32.totalorder %v1590_v37, %v1621_v54  ;;  %vm732_vm7 = vcmp.eq.s32.totalorder %v1590_v37, %v1625_v55  ;;  %vm733_vm8 = vcmp.eq.s32.totalorder %v1590_v37, %v1635_v62 }
  0x66   : > { %vm262_vm2 = vcmask 3072  }
  0x67   : > { %v1603_v16 = vpop.eup %1206  ;;  %263 = vst.msk [vmem:[%s253_s21] sm:$0xf] %vm262_vm2, %v1368_v34  ;;  %264 = vst.msk [vmem:[%s257_s27] sm:$0xf] %vm262_vm2, %v1368_v34 }
  0x68   : > { %v1613_v50 = vpop.eup %1208  ;;  %v476_v51 = vcombine.high %v1603_v16, %v1603_v16  ;;  %v492_v53 = vsel %vm299_vm0, %v1603_v16, 0.0 }
  0x69   : > { %v1627_v56 = vpop.eup %1210  ;;  %v477_v57 = vcombine.high %v1613_v50, %v1613_v50  ;;  %v493_v58 = vrot.slane %v492_v53, 4  ;;  %v506_v59 = vsel %vm299_vm0, %v1613_v50, 0.0 }
  0x6a   : > { %v478_v17 = vcombine.high %v1627_v56, %v1627_v56  ;;  %v499_v63 = vsel %vm299_vm0, %v476_v51, 0.0  ;;  %v507_v7 = vrot.slane %v506_v59, 4  ;;  %v520_v8 = vsel %vm299_vm0, %v1627_v56, 0.0  ;;  %v1642_v9 = vpop.eup %1212 }
  0x6b   : > { %v494_v15 = vadd.f32 %v493_v58, %v492_v53  ;;  %v500_v18 = vrot.slane %v499_v63, 4  ;;  %v513_v19 = vsel %vm299_vm0, %v477_v57, 0.0  ;;  %v521_v24 = vrot.slane %v520_v8, 4  ;;  %v1649_v28 = vpop.eup %1214 }
  0x6c   : > { %v508_v22 = vadd.f32 %v507_v7, %v506_v59  ;;  %v514_v23 = vrot.slane %v513_v19, 4  ;;  %v527_v27 = vsel %vm299_vm0, %v478_v17, 0.0  ;;  %v479_v29 = vcombine.high %v1642_v9, %v1642_v9  ;;  %v1654_v52 = vpop.eup %1216 }
  0x6d   : > { %v495_v25 = vrot.slane %v494_v15, 2  ;;  %v501_v26 = vadd.f32 %v500_v18, %v499_v63  ;;  %v522_v32 = vadd.f32 %v521_v24, %v520_v8  ;;  %v528_v33 = vrot.slane %v527_v27, 4  ;;  %v1657_v61 = vpop.eup %1218 }
  0x6e   : > { %v509_v30 = vrot.slane %v508_v22, 2  ;;  %v515_v31 = vadd.f32 %v514_v23, %v513_v19  ;;  %v534_v6 = vsel %vm299_vm0, %v1642_v9, 0.0  ;;  %v1676_v21 = vpop.eup %1220  ;;  %v541_v3 = vsel %vm299_vm0, %v479_v29, 0.0 }
  0x6f   : > { %v496_v60 = vadd.f32 %v495_v25, %v494_v15  ;;  %v502_v13 = vrot.slane %v501_v26, 2  ;;  %v529_v0 = vadd.f32 %v528_v33, %v527_v27  ;;  %v535_v1 = vrot.slane %v534_v6, 4 }
  0x70   : > { %v510_v36 = vadd.f32 %v509_v30, %v508_v22  ;;  %v516_v2 = vrot.slane %v515_v31, 2  ;;  %v480_v4 = vcombine.high %v1649_v28, %v1649_v28  ;;  %v523_v45 = vrot.slane %v522_v32, 2 }
  0x71   : > { %v497_v40 = vrot.slane %v496_v60, 1  ;;  %v536_v46 = vadd.f32 %v535_v1, %v534_v6  ;;  %v481_v47 = vcombine.high %v1654_v52, %v1654_v52  ;;  %v482_v49 = vcombine.high %v1657_v61, %v1657_v61 }
  0x72   : > { %v483_v48 = vcombine.high %v1676_v21, %v1676_v21  ;;  %v542_v51 = vrot.slane %v541_v3, 4  ;;  %v503_v53 = vadd.f32 %v502_v13, %v501_v26  ;;  %v511_v57 = vrot.slane %v510_v36, 1 }
  0x73   : > { %v530_v58 = vrot.slane %v529_v0, 2  ;;  %v548_v59 = vsel %vm299_vm0, %v1649_v28, 0.0  ;;  %v517_v17 = vadd.f32 %v516_v2, %v515_v31  ;;  %v537_v63 = vrot.slane %v536_v46, 2 }
  0x74   : > { %v543_v7 = vadd.f32 %v542_v51, %v541_v3  ;;  %v549_v8 = vrot.slane %v548_v59, 4  ;;  %v498_v15 = vadd.f32 %v497_v40, %v496_v60  ;;  %v524_v18 = vadd.f32 %v523_v45, %v522_v32 }
  0x75   : > { %v555_v19 = vsel %vm299_vm0, %v480_v4, 0.0  ;;  %v562_v22 = vsel %vm299_vm0, %v1654_v52, 0.0  ;;  %v504_v27 = vrot.slane %v503_v53, 1  ;;  %v531_v29 = vadd.f32 %v530_v58, %v529_v0 }
  0x76   : > { %v544_v23 = vrot.slane %v543_v7, 2  ;;  %v550_v24 = vadd.f32 %v549_v8, %v548_v59  ;;  %v556_v25 = vrot.slane %v555_v19, 4  ;;  %v563_v26 = vrot.slane %v562_v22, 4 }
  0x77   : > { %v569_v30 = vsel %vm299_vm0, %v481_v47, 0.0  ;;  %v576_v31 = vsel %vm299_vm0, %v1657_v61, 0.0  ;;  %v538_v33 = vadd.f32 %v537_v63, %v536_v46  ;;  %v512_v13 = vadd.f32 %v511_v57, %v510_v36 }
  0x78   : > { %v551_v6 = vrot.slane %v550_v24, 2  ;;  %v557_v60 = vadd.f32 %v556_v25, %v555_v19  ;;  %v564_v32 = vadd.f32 %v563_v26, %v562_v22  ;;  %v570_v1 = vrot.slane %v569_v30, 4 }
  0x79   : > { %v577_v2 = vrot.slane %v576_v31, 4  ;;  %v583_v3 = vsel %vm299_vm0, %v482_v49, 0.0  ;;  %v518_v4 = vrot.slane %v517_v17, 1  ;;  %v545_v40 = vadd.f32 %v544_v23, %v543_v7 }
  0x7a   : > { %v558_v45 = vrot.slane %v557_v60, 2  ;;  %v565_v51 = vrot.slane %v564_v32, 2  ;;  %v571_v59 = vadd.f32 %v570_v1, %v569_v30  ;;  %v584_v58 = vrot.slane %v583_v3, 4 }
  0x7b   : > { %v578_v0 = vadd.f32 %v577_v2, %v576_v31  ;;  %v590_v47 = vsel %vm299_vm0, %v1676_v21, 0.0  ;;  %v525_v8 = vrot.slane %v524_v18, 1  ;;  %v532_v46 = vrot.slane %v531_v29, 1 }
  0x7c   : > { %v539_v63 = vrot.slane %v538_v33, 1  ;;  %v552_v19 = vadd.f32 %v551_v6, %v550_v24  ;;  %v559_v22 = vadd.f32 %v558_v45, %v557_v60  ;;  %v572_v36 = vrot.slane %v571_v59, 2 }
  0x7d   : > { %v585_v57 = vadd.f32 %v584_v58, %v583_v3  ;;  %v591_v25 = vrot.slane %v590_v47, 4  ;;  %v505_v26 = vadd.f32 %v504_v27, %v503_v53  ;;  %v519_v49 = vadd.f32 %v518_v4, %v517_v17 }
  0x7e   : > { %v566_v44 = vadd.f32 %v565_v51, %v564_v32  ;;  %v597_v7 = vsel %vm299_vm0, %v483_v48, 0.0  ;;  %v546_v23 = vrot.slane %v545_v40, 1  ;;  %v579_v30 = vrot.slane %v578_v0, 2 }
  0x7f   : > { %v586_v31 = vrot.slane %v585_v57, 2  ;;  %v592_v1 = vadd.f32 %v591_v25, %v590_v47  ;;  %v526_v2 = vadd.f32 %v525_v8, %v524_v18  ;;  %v533_v43 = vadd.f32 %v532_v46, %v531_v29 }
  0x80   : > { %v598_v42 = vrot.slane %v597_v7, 4  ;;  %1222 = vrcp.f32 %v498_v15  ;;  %v540_v24 = vadd.f32 %v539_v63, %v538_v33  ;;  %v553_v6 = vrot.slane %v552_v19, 1 }
  0x81   : > { %v560_v60 = vrot.slane %v559_v22, 1  ;;  %v573_v3 = vadd.f32 %v572_v36, %v571_v59  ;;  %v567_v53 = vrot.slane %v566_v44, 1  ;;  %1224 = vrcp.f32 %v505_v26 }
  0x82   : > { %v599_v48 = vadd.f32 %v598_v42, %v597_v7  ;;  %v933_v17 = vsel %vm299_vm0, %v1664_v35, 0.0  ;;  %v547_v27 = vadd.f32 %v546_v23, %v545_v40  ;;  %v580_v32 = vadd.f32 %v579_v30, %v578_v0 }
  0x83   : > { %v587_v4 = vadd.f32 %v586_v31, %v585_v57  ;;  %v593_v18 = vrot.slane %v592_v1, 2  ;;  %1226 = vrcp.f32 %v512_v13  ;;  %v934_v15 = vsel %vm299_vm0, %v1669_v12, 0.0  ;;  %v1720_v13 = vld [vmem:[%s1490_s20 + $0x8] sm:$0xff] }
  0x84   : > { %v600_v29 = vrot.slane %v599_v48, 2  ;;  %v936_v33 = vsel %vm299_vm0, %v1674_v20, 0.0  ;;  %v554_v45 = vadd.f32 %v553_v6, %v552_v19  ;;  %v574_v51 = vrot.slane %v573_v3, 1 }
  0x85   : > { %1228 = vrcp.f32 %v519_v49  ;;  %v935_v42 = vadd.f32 %v934_v15, %v933_v17  ;;  %v561_v59 = vadd.f32 %v560_v60, %v559_v22  ;;  %v568_v58 = vadd.f32 %v567_v53, %v566_v44 }
  0x86   : > { %1230 = vrcp.f32 %v526_v2  ;;  %v938_v40 = vsel %vm299_vm0, %v1682_v14, 0.0  ;;  %v581_v0 = vrot.slane %v580_v32, 1  ;;  %v594_v47 = vadd.f32 %v593_v18, %v592_v1 }
  0x87   : > { %1232 = vrcp.f32 %v533_v43  ;;  %v937_v8 = vadd.f32 %v936_v33, %v935_v42  ;;  %v588_v46 = vrot.slane %v587_v4, 1  ;;  %v601_v63 = vadd.f32 %v600_v29, %v599_v48 }
  0x88   : > { %1234 = vrcp.f32 %v540_v24  ;;  %v940_v19 = vsel %vm299_vm0, %v1685_v38, 0.0  ;;  %v575_v36 = vadd.f32 %v574_v51, %v573_v3  ;;  %v1728_v44 = vsel %vm731_vm6, 1.0, %v1368_v34 }
  0x89   : > { %1236 = vrcp.f32 %v547_v27  ;;  %v939_v22 = vadd.f32 %v938_v40, %v937_v8  ;;  %v697_v43 = vrot.slane %v1720_v13, %v664_v5  ;;  %v942_v57 = vsel %vm299_vm0, %v1728_v44, 0.0 }
  0x8a   : > { %1238 = vrcp.f32 %v554_v45  ;;  %v582_v25 = vadd.f32 %v581_v0, %v580_v32  ;;  %v595_v26 = vrot.slane %v594_v47, 1  ;;  %v589_v7 = vadd.f32 %v588_v46, %v587_v4 }
  0x8b   : > { %1240 = vrcp.f32 %v561_v59  ;;  %v941_v49 = vadd.f32 %v940_v19, %v939_v22  ;;  %v602_v54 = vrot.slane %v601_v63, 1  ;;  %v1741_v23 = vsel %vm732_vm7, 1.0, %v1368_v34 }
  0x8c   : > { %1242 = vrcp.f32 %v568_v58  ;;  %v944_v31 = vsel %vm299_vm0, %v1741_v23, 0.0  ;;  %v596_v2 = vadd.f32 %v595_v26, %v594_v47  ;;  %vm734_vm9 = vcmp.eq.s32.totalorder %v1590_v37, %v697_v43 }
  0x8d   : > { %v1223_v5 = vpop.eup %1222  ;;  %1244 = vrcp.f32 %v575_v36  ;;  %v943_v30 = vadd.f32 %v942_v57, %v941_v49  ;;  %v1750_v24 = vsel %vm733_vm8, 1.0, %v1368_v34  ;;  %v603_v55 = vadd.f32 %v602_v54, %v601_v63 }
  0x8e   : > { %v1225_v1 = vpop.eup %1224  ;;  %1246 = vrcp.f32 %v582_v25  ;;  %v701_v53 = vrot.slane %v1720_v13, %v668_v39  ;;  %v946_v48 = vsel %vm299_vm0, %v1750_v24, 0.0  ;;  %v705_v62 = vrot.slane %v1720_v13, %v672_v10 }
  0x8f   : > { %1248 = vrcp.f32 %v589_v7  ;;  %v636_v6 = vcombine.low %v1223_v5, %v1225_v1  ;;  %v945_v60 = vadd.f32 %v944_v31, %v943_v30  ;;  %v1764_v18 = vrot.slane %v1720_v13, %v676_v11 }
  0x90   : > { %v1227_v3 = vpop.eup %1226  ;;  %1250 = vrcp.f32 %v596_v2  ;;  %v1769_v39 = vsel %vm734_vm9, 1.0, %v1368_v34  ;;  %vm735_vm10 = vcmp.eq.s32.totalorder %v1590_v37, %v701_v53  ;;  %v713_v58 = vrot.slane %v1720_v13, %v680_v41 }
  0x91   : > { %v652_v27 = vmul.f32 %v1603_v16, %v636_v6  ;;  %1252 = vrcp.f32 %v603_v55  ;;  %v947_v33 = vadd.f32 %v946_v48, %v945_v60  ;;  %v948_v11 = vsel %vm299_vm0, %v1769_v39, 0.0 }
  0x92   : > { %v1229_v17 = vpop.eup %1228  ;;  %v1935_v40 = vsub.s32 5, %v1590_v37  ;;  %v1936_v43 = vsub.s32 6, %v1590_v37  ;;  %v1795_v57 = vsel %vm735_vm10, 1.0, %v1368_v34  ;;  %vm736_vm11 = vcmp.eq.s32.totalorder %v1590_v37, %v705_v62 }
  0x93   : > { %v1231_v32 = vpop.eup %1230  ;;  %v637_v4 = vcombine.low %v1227_v3, %v1229_v17  ;;  %v884_v16 = vcombine.high %v652_v27, %v652_v27  ;;  %v900_v15 = vsel %vm299_vm0, %v652_v27, 0.0  ;;  %v949_v25 = vadd.f32 %v948_v11, %v947_v33 }
  0x94   : > { %v1233_v29 = vpop.eup %1232  ;;  %v1783_v0 = vrot.slane %v1720_v13, %v1935_v40  ;;  %v1792_v41 = vrot.slane %v1720_v13, %v1936_v43  ;;  %v950_v30 = vsel %vm299_vm0, %v1795_v57, 0.0  ;;  %v1937_v1 = vsub.s32 7, %v1590_v37 }
  0x95   : > { %v1235_v10 = vpop.eup %1234  ;;  %v638_v45 = vcombine.low %v1231_v32, %v1233_v29  ;;  %v653_v51 = vmul.f32 %v1613_v50, %v637_v4  ;;  %v901_v59 = vsel %vm299_vm0, %v884_v16, 0.0  ;;  %v791_v50 = vcombine.low %v1664_v35, %v1669_v12 }
  0x96   : > { %v1237_v42 = vpop.eup %1236  ;;  %v902_v19 = vadd.f32 %v901_v59, %v900_v15  ;;  %v1806_v2 = vrot.slane %v1720_v13, %v1937_v1  ;;  %vm737_vm12 = vcmp.eq.s32.totalorder %v1590_v37, %v1764_v18  ;;  %v1817_v13 = vsel %vm736_vm11, 1.0, %v1368_v34 }
  0x97   : > { %v1239_v47 = vpop.eup %1238  ;;  %v639_v8 = vcombine.low %v1235_v10, %v1237_v42  ;;  %v654_v46 = vmul.f32 %v1627_v56, %v638_v45  ;;  %v885_v63 = vcombine.high %v653_v51, %v653_v51  ;;  %v903_v22 = vsel %vm299_vm0, %v653_v51, 0.0 }
  0x98   : > { %v1241_v36 = vpop.eup %1240  ;;  %v904_v56 = vadd.f32 %v903_v22, %v902_v19  ;;  %v807_v55 = vmul.f32 %v791_v50, %v652_v27  ;;  %v951_v32 = vadd.f32 %v950_v30, %v949_v25  ;;  %vm738_vm13 = vcmp.eq.s32.totalorder %v1590_v37, %v713_v58 }
  0x99   : > { %v1243_v26 = vpop.eup %1242  ;;  %v640_v35 = vcombine.low %v1239_v47, %v1241_v36  ;;  %v655_v12 = vmul.f32 %v1642_v9, %v639_v8  ;;  %v886_v49 = vcombine.high %v654_v46, %v654_v46  ;;  %v905_v54 = vsel %vm299_vm0, %v885_v63, 0.0 }
  0x9a   : > { %v1245_v7 = vpop.eup %1244  ;;  %v907_v5 = vsel %vm299_vm0, %v654_v46, 0.0  ;;  %v906_v31 = vadd.f32 %v905_v54, %v904_v56  ;;  %v792_v9 = vcombine.low %v1674_v20, %v1682_v14  ;;  %vm739_vm14 = vcmp.eq.s32.totalorder %v1590_v37, %v1783_v0 }
  0x9b   : > { %v1247_v6 = vpop.eup %1246  ;;  %v641_v60 = vcombine.low %v1243_v26, %v1245_v7  ;;  %v1811_v3 = vmul.f32 %v1649_v28, %v640_v35  ;;  %v887_v53 = vcombine.high %v655_v12, %v655_v12  ;;  %v909_v48 = vsel %vm299_vm0, %v886_v49, 0.0 }
  0x9c   : > { %v1249_v17 = vpop.eup %1248  ;;  %v908_v62 = vadd.f32 %v907_v5, %v906_v31  ;;  %v911_v20 = vsel %vm299_vm0, %v655_v12, 0.0  ;;  %v952_v28 = vsel %vm299_vm0, %v1817_v13, 0.0  ;;  %v793_v27 = vcombine.low %v1685_v38, %v1728_v44 }
  0x9d   : > { %v808_v4 = vmul.f32 %v792_v9, %v653_v51  ;;  %v823_v29 = vcombine.high %v807_v55, %v807_v55  ;;  %v1251_v16 = vpop.eup %1250  ;;  %v642_v15 = vcombine.low %v1247_v6, %v1249_v17  ;;  %v657_v33 = vmul.f32 %v1654_v52, %v641_v60 }
  0x9e   : > { %v910_v14 = vadd.f32 %v909_v48, %v908_v62  ;;  %v888_v10 = vcombine.high %v1811_v3, %v1811_v3  ;;  %v913_v45 = vsel %vm299_vm0, %v887_v53, 0.0  ;;  %v1253_v11 = vpop.eup %1252  ;;  %vm740_vm15 = vcmp.eq.s32.totalorder %v1590_v37, %v1792_v41 }
  0x9f   : > { %v1128_v38 = vsel %vm737_vm12, 1.0, %v1368_v34  ;;  %v1840_v44 = vsel %vm738_vm13, 1.0, %v1368_v34  ;;  %v953_v52 = vadd.f32 %v952_v28, %v951_v32  ;;  %v915_v51 = vsel %vm299_vm0, %v1811_v3, 0.0 }
  0xa0   : > { %v912_v42 = vadd.f32 %v911_v20, %v910_v14  ;;  %v954_v59 = vsel %vm299_vm0, %v1128_v38, 0.0  ;;  %v794_v40 = vcombine.low %v1741_v23, %v1750_v24  ;;  %v839_v50 = vsel %vm299_vm0, %v807_v55, 0.0 }
  0xa1   : > { %v809_v8 = vmul.f32 %v793_v27, %v654_v46  ;;  %v824_v18 = vcombine.high %v808_v4, %v808_v4  ;;  %v840_v63 = vsel %vm299_vm0, %v823_v29, 0.0  ;;  %v643_v19 = vcombine.low %v1251_v16, %v1253_v11 }
  0xa2   : > { %v914_v47 = vadd.f32 %v913_v45, %v912_v42  ;;  %v658_v58 = vmul.f32 %v1657_v61, %v642_v15  ;;  %v889_v36 = vcombine.high %v657_v33, %v657_v33  ;;  %v917_v22 = vsel %vm299_vm0, %v888_v10, 0.0 }
  0xa3   : > { %vm741_vm1 = vcmp.eq.s32.totalorder %v1590_v37, %v1806_v2  ;;  %v955_v25 = vadd.f32 %v954_v59, %v953_v52  ;;  %v956_v23 = vsel %vm299_vm0, %v1840_v44, 0.0  ;;  %v919_v24 = vsel %vm299_vm0, %v657_v33, 0.0 }
  0xa4   : > { %v916_v43 = vadd.f32 %v915_v51, %v914_v47  ;;  %v795_v46 = vcombine.low %v1769_v39, %v1795_v57  ;;  %v841_v26 = vadd.f32 %v840_v63, %v839_v50  ;;  %v842_v35 = vsel %vm299_vm0, %v808_v4, 0.0 }
  0xa5   : > { %v810_v49 = vmul.f32 %v794_v40, %v655_v12  ;;  %v825_v56 = vcombine.high %v809_v8, %v809_v8  ;;  %v844_v7 = vsel %vm299_vm0, %v824_v18, 0.0  ;;  %v659_v54 = vmul.f32 %v1676_v21, %v643_v19 }
  0xa6   : > { %v918_v61 = vadd.f32 %v917_v22, %v916_v43  ;;  %v890_v5 = vcombine.high %v658_v58, %v658_v58  ;;  %v921_v30 = vsel %vm299_vm0, %v889_v36, 0.0  ;;  %v843_v31 = vadd.f32 %v842_v35, %v841_v26 }
  0xa7   : > { %v1130_v39 = vsel %vm739_vm14, 1.0, %v1368_v34  ;;  %v957_v57 = vadd.f32 %v956_v23, %v955_v25  ;;  %v846_v9 = vsel %vm299_vm0, %v809_v8, 0.0  ;;  %v923_v12 = vsel %vm299_vm0, %v658_v58, 0.0 }
  0xa8   : > { %v920_v1 = vadd.f32 %v919_v24, %v918_v61  ;;  %v958_v55 = vsel %vm299_vm0, %v1130_v39, 0.0  ;;  %v796_v6 = vcombine.low %v1817_v13, %v1128_v38  ;;  %v845_v21 = vadd.f32 %v844_v7, %v843_v31 }
  0xa9   : > { %v811_v53 = vmul.f32 %v795_v46, %v1811_v3  ;;  %v826_v48 = vcombine.high %v810_v49, %v810_v49  ;;  %v848_v17 = vsel %vm299_vm0, %v825_v56, 0.0  ;;  %v891_v62 = vcombine.high %v659_v54, %v659_v54 }
  0xaa   : > { %v922_v60 = vadd.f32 %v921_v30, %v920_v1  ;;  %v925_v0 = vsel %vm299_vm0, %v890_v5, 0.0  ;;  %v1131_v32 = vsel %vm740_vm15, 1.0, %v1368_v34  ;;  %v847_v20 = vadd.f32 %v846_v9, %v845_v21  ;;  %v875_v5 = vld [vmem:[%s257_s27] sm:$0xf] }
  0xab   : > { %v1132_v13 = vsel %vm741_vm1, 1.0, %v1368_v34  ;;  %v959_v14 = vadd.f32 %v958_v55, %v957_v57  ;;  %v850_v3 = vsel %vm299_vm0, %v810_v49, 0.0  ;;  %v927_v27 = vsel %vm299_vm0, %v659_v54, 0.0  ;;  %v774_v1 = vld [vmem:[%s253_s21] sm:$0xf] }
  0xac   : > { %v924_v28 = vadd.f32 %v923_v12, %v922_v60  ;;  %v960_v4 = vsel %vm299_vm0, %v1131_v32, 0.0  ;;  %v797_v29 = vcombine.low %v1840_v44, %v1130_v39  ;;  %v849_v16 = vadd.f32 %v848_v17, %v847_v20 }
  0xad   : > { %v812_v41 = vmul.f32 %v796_v6, %v657_v33  ;;  %v827_v10 = vcombine.high %v811_v53, %v811_v53  ;;  %v852_v45 = vsel %vm299_vm0, %v826_v48, 0.0  ;;  %v929_v11 = vsel %vm299_vm0, %v891_v62, 0.0 }
  0xae   : > { %v926_v15 = vadd.f32 %v925_v0, %v924_v28  ;;  %v851_v42 = vadd.f32 %v850_v3, %v849_v16  ;;  %v961_v2 = vadd.f32 %v960_v4, %v959_v14  ;;  %v854_v38 = vsel %vm299_vm0, %v811_v53, 0.0 }
  0xaf   : > { %v962_v52 = vsel %vm299_vm0, %v1132_v13, 0.0  ;;  %v798_v51 = vcombine.low %v1131_v32, %v1132_v13  ;;  %v813_v50 = vmul.f32 %v797_v29, %v658_v58  ;;  %v828_v44 = vcombine.high %v812_v41, %v812_v41 }
  0xb0   : > { %v928_v37 = vadd.f32 %v927_v27, %v926_v15  ;;  %v853_v59 = vadd.f32 %v852_v45, %v851_v42  ;;  %v856_v47 = vsel %vm299_vm0, %v827_v10, 0.0  ;;  %v963_v8 = vadd.f32 %v962_v52, %v961_v2 }
  0xb1   : > { %v858_v18 = vsel %vm299_vm0, %v812_v41, 0.0  ;;  %v814_v19 = vmul.f32 %v798_v51, %v659_v54  ;;  %v829_v36 = vcombine.high %v813_v50, %v813_v50  ;;  %v860_v22 = vsel %vm299_vm0, %v828_v44, 0.0 }
  0xb2   : > { %v930_v40 = vadd.f32 %v929_v11, %v928_v37  ;;  %v855_v33 = vadd.f32 %v854_v38, %v853_v59  ;;  %v862_v25 = vsel %vm299_vm0, %v813_v50, 0.0 }
  0xb3   : > { %v830_v23 = vcombine.high %v814_v19, %v814_v19  ;;  %v864_v24 = vsel %vm299_vm0, %v829_v36, 0.0  ;;  %v866_v26 = vsel %vm299_vm0, %v814_v19, 0.0 }
  0xb4   : > { %931 = vadd.xlane.f32.xlu0 %v930_v40  ;;  %v857_v63 = vadd.f32 %v856_v47, %v855_v33 }
  0xb5   : > { %v868_v61 = vsel %vm299_vm0, %v830_v23, 0.0 }
  0xb6   : > { %v859_v43 = vadd.f32 %v858_v18, %v857_v63 }
  0xb8   : > { %964 = vadd.xlane.f32.xlu0 %v963_v8  ;;  %v861_v58 = vadd.f32 %v860_v22, %v859_v43 }
  0xba   : > { %v863_v46 = vadd.f32 %v862_v25, %v861_v58 }
  0xbc   : > { %v865_v35 = vadd.f32 %v864_v24, %v863_v46 }
  0xbe   : > { %v867_v49 = vadd.f32 %v866_v26, %v865_v35 }
  0xc0   : > { %v869_v56 = vadd.f32 %v868_v61, %v867_v49 }
  0xc2   : > { %870 = vadd.xlane.f32.xlu1 %v869_v56 }
 0x13d   : > { %v932_v7 = vpop.xlane.xlu0 %931 }
 0x141   : > { %v965_v54 = vpop.xlane.xlu0 %964 }
 0x142   : > { %v966_v30 = vadd.f32 %v965_v54, %v932_v7 }
 0x144   : > { %v967_v31 = vadd.f32 %v966_v30, %v875_v5 }
 0x146   : > { %968 = vst.msk [vmem:[%s257_s27] sm:$0xf] %vm262_vm2, %v967_v31 }
 0x14b   : > { %v871_v39 = vpop.xlane.xlu1 %870 }
 0x14c   : > { %v872_v57 = vadd.f32 %v871_v39, %v774_v1 }
 0x14e   : > { %874 = vst.msk [vmem:[%s253_s21] sm:$0xf] %vm262_vm2, %v872_v57 }
 0x14f PF: > { %s20_s17 = sadd.s32 1, %s1364_s17   ;;  %s1938_s12 = smov %s1348_s13 }
 0x150   : > { %p17_p9 = scmp.ge.s32.totalorder %s20_s17, 4   ;;  %s1939_s13 = smov %s1352_s14 }
 0x151   : > { %s1940_s14 = smov %s1438_s24  ;;  %s1941_s15 = smov %s1360_s16 }
 0x152   : > { %s1942_s16 = smov %s1944_s19  ;;  %19 = sbr.rel (!%p17_p9) target bundleno = 6 (0x6), region = 97 }
 0x157   :  { %1002 = vsyncpa [#allocation3], 1 }
 0x158   :  { %1004 = vsyncpa [#allocation3 + $0x1], 1 }
 0x159   :  { %1005 = vsyncpa [#allocation5], 1 }
 0x15a   :  { %1007 = vsyncpa [#allocation5 + $0x1], 1 }

</bundles_post_ra>
